<compile_context>
chip_gen: v7x
topology: tpu7x:2x2x1
jax: 0.10.0
libtpu: 0.0.40
codegen_flags: <defaults>
</compile_context>

<pallas_src>
import jax
import jax.numpy as jnp
from jax.experimental import pallas as pl
from jax.experimental.pallas import tpu as pltpu


def positional_encoding_kernel(x_ref, cls_ref, pos_ref, o_ref):
    # x_ref: (Bt, S, Dt)   cls_ref: (1, Dt)   pos_ref: (S+1, Dt)   o_ref: (Bt, S+1, Dt)
    bt, s_plus_1, d = o_ref.shape
    s = s_plus_1 - 1
    pos = pos_ref[...]                                   # (S+1, Dt)
    cls_row = cls_ref[...] + pos[0:1, :]                 # (1, Dt), batch-invariant

    if s >= 7:
        # Rows 0..7 as one sublane-aligned (Bt, 8, Dt) store:
        #   row 0      = cls + pos[0]
        #   rows 1..7  = x[0:7] + pos[1:8]
        head = jnp.concatenate(
            [
                jnp.broadcast_to(cls_row[None, :, :], (bt, 1, d)),
                x_ref[:, 0:7, :] + pos[1:8, :][None, :, :],
            ],
            axis=1,
        )
        o_ref[:, 0:8, :] = head.astype(o_ref.dtype)
        if s_plus_1 > 8:
            # Rows 8..S: store starts at an 8-row boundary (aligned); the +7
            # offset lives on the load side (x), where slots are plentiful.
            o_ref[:, 8:, :] = (
                x_ref[:, 7:, :] + pos[8:, :][None, :, :]
            ).astype(o_ref.dtype)
    else:
        # Tiny-sequence fallback (fewer than 8 output rows): two small stores.
        o_ref[:, 0:1, :] = jnp.broadcast_to(
            cls_row[None, :, :], (bt, 1, d)
        ).astype(o_ref.dtype)
        o_ref[:, 1:, :] = (x_ref[...] + pos[1:, :][None, :, :]).astype(o_ref.dtype)


def _choose_tiles(B, S, D, dsize, *, block_budget_bytes=12 << 20, min_steps=4):
    """Pick (batch_tile, d_tile) so one step's x + out blocks fit the budget,
    preferring >= min_steps grid steps (even when possible), then the largest
    block."""

    def divisors(n):
        return [d for d in range(1, n + 1) if n % d == 0]

    def block_bytes(bt, dt):
        # x block + out block, single copy (pipelining double-buffers each).
        return (bt * S * dt + bt * (S + 1) * dt) * dsize

    if D % 128 == 0:
        d_tiles = [k * 128 for k in divisors(D // 128)]
    else:
        d_tiles = [D]  # cannot split D without breaking the (8,128) lane rule

    best = None
    best_key = None
    for dt in d_tiles:
        for bt in divisors(B):
            steps = (B // bt) * (D // dt)
            nbytes = block_bytes(bt, dt)
            key = (
                nbytes <= block_budget_bytes,   # 1) fit the per-step VMEM budget
                min(steps, min_steps),          # 2) enough steps to pipeline
                steps % 2 == 0,                 # 3) even grid (2 TCs on v7x)
                nbytes,                         # 4) biggest block (amortize overhead)
                dt,                             # 5) prefer full-D (fewer pos re-DMAs)
            )
            if best_key is None or key > best_key:
                best_key, best = key, (bt, dt)
    return best


def positional_encoding(x, class_token, positional_embeddings, *, batch_tile=None):
    """x: (B, S, D); class_token: (1, 1, D); positional_embeddings: (1, S+1, D).

    Returns (B, S+1, D) = concat([class_token.expand(B,1,D), x], axis=1) + pos_emb.
    """
    B, S, D = x.shape
    assert class_token.shape == (1, 1, D)
    assert positional_embeddings.shape == (1, S + 1, D)

    dsize = jnp.dtype(x.dtype).itemsize
    if batch_tile is None:
        batch_tile, d_tile = _choose_tiles(B, S, D, dsize)
    else:
        if B % batch_tile != 0 or batch_tile < 1:
            raise ValueError(f"batch_tile={batch_tile} must divide the batch size {B}")
        d_tile = D
    grid = (B // batch_tile, D // d_tile)

    # Parameters as clean 2-D VMEM tiles (drop the leading broadcast dims).
    cls2 = class_token.reshape(1, D)
    pos2 = positional_embeddings.reshape(S + 1, D)

    bytes_accessed = (B * S * D + B * (S + 1) * D + (S + 1) * D + D) * dsize
    cost = pl.CostEstimate(
        flops=B * (S + 1) * D, transcendentals=0, bytes_accessed=bytes_accessed
    )

    return pl.pallas_call(
        positional_encoding_kernel,
        out_shape=jax.ShapeDtypeStruct((B, S + 1, D), x.dtype),
        grid=grid,
        in_specs=[
            # x: one (batch, D) tile per step.
            pl.BlockSpec((batch_tile, S, d_tile), lambda b, di: (b, 0, di)),
            # class token / positional embeddings: batch-grid-invariant tiles.
            pl.BlockSpec((1, d_tile), lambda b, di: (0, di)),
            pl.BlockSpec((S + 1, d_tile), lambda b, di: (0, di)),
        ],
        out_specs=pl.BlockSpec((batch_tile, S + 1, d_tile), lambda b, di: (b, 0, di)),
        compiler_params=pltpu.CompilerParams(
            dimension_semantics=("parallel", "parallel"),
            vmem_limit_bytes=48 * 1024 * 1024,
        ),
        cost_estimate=cost,
    )(x, cls2, pos2)


def _reference(x, class_token, positional_embeddings):
    B = x.shape[0]
    cls = jnp.broadcast_to(class_token, (B, 1, x.shape[-1]))
    return jnp.concatenate([cls, x], axis=1) + positional_embeddings


if __name__ == "__main__":
    B, n_patches, D = 2, 8, 32  # batch, patches, embedding_dim
    # NOTE: D=32 is a toy shape (masked lane stores); real ViT dims (768/1024)
    # are multiples of 128 and get full-lane-width unmasked stores.

    key = jax.random.PRNGKey(0)
    kx, kpos, kcls = jax.random.split(key, 3)

    x = jax.random.normal(kx, (B, n_patches, D), dtype=jnp.float32)
    positional_embeddings = jax.random.normal(
        kpos, (1, n_patches + 1, D), dtype=jnp.float32
    )
    class_token = jax.random.normal(kcls, (1, 1, D), dtype=jnp.float32)

    out = positional_encoding(x, class_token, positional_embeddings)
    out = jax.block_until_ready(out)

    ref = _reference(x, class_token, positional_embeddings)
    assert out.shape == (B, n_patches + 1, D)
    assert jnp.allclose(out, ref, atol=1e-6, rtol=1e-6), "mismatch vs reference"

    print("KERNEL_OK")
</pallas_src>

<mosaic_0001>
module attributes {stable_mosaic.version = 11 : i64} {
  func.func @positional_encoding_kernel(%arg0: i32, %arg1: i32, %arg2: memref<1x8x32xf32, #tpu.memory_space<vmem>>, %arg3: memref<1x32xf32, #tpu.memory_space<vmem>>, %arg4: memref<9x32xf32, #tpu.memory_space<vmem>>, %arg5: memref<1x9x32xf32, #tpu.memory_space<vmem>>) attributes {dimension_semantics = [#tpu.dimension_semantics<parallel>, #tpu.dimension_semantics<parallel>], iteration_bounds = array<i64: 2, 1>, scalar_prefetch = 0 : i64, scratch_operands = 0 : i64, tpu.core_type = #tpu.core_type<tc>, window_params = [{transform_indices = @transform_0, window_bounds = array<i64: 1, 8, 32>}, {transform_indices = @transform_1, window_bounds = array<i64: 1, 32>}, {transform_indices = @transform_2, window_bounds = array<i64: 9, 32>}, {transform_indices = @transform_3, window_bounds = array<i64: 1, 9, 32>}]} {
    %c0 = arith.constant 0 : index
    %c0_0 = arith.constant 0 : index
    %0 = vector.load %arg4[%c0, %c0_0] : memref<9x32xf32, #tpu.memory_space<vmem>>, vector<9x32xf32>
    %c0_1 = arith.constant 0 : index
    %c0_2 = arith.constant 0 : index
    %1 = vector.load %arg3[%c0_1, %c0_2] : memref<1x32xf32, #tpu.memory_space<vmem>>, vector<1x32xf32>
    %2 = vector.extract_strided_slice %0 {offsets = [0, 0], sizes = [1, 32], strides = [1, 1]} : vector<9x32xf32> to vector<1x32xf32>
    %3 = arith.addf %1, %2 : vector<1x32xf32>
    %4 = vector.shape_cast %3 : vector<1x32xf32> to vector<1x1x32xf32>
    %c0_3 = arith.constant 0 : index
    %c0_4 = arith.constant 0 : index
    %c0_5 = arith.constant 0 : index
    %5 = vector.load %arg2[%c0_3, %c0_4, %c0_5] : memref<1x8x32xf32, #tpu.memory_space<vmem>>, vector<1x7x32xf32>
    %6 = vector.extract_strided_slice %0 {offsets = [1, 0], sizes = [7, 32], strides = [1, 1]} : vector<9x32xf32> to vector<7x32xf32>
    %7 = vector.shape_cast %6 : vector<7x32xf32> to vector<1x7x32xf32>
    %8 = arith.addf %5, %7 : vector<1x7x32xf32>
    %9 = tpu.concatenate %4, %8 in 1 : vector<1x1x32xf32>, vector<1x7x32xf32> -> vector<1x8x32xf32>
    %c0_6 = arith.constant 0 : index
    %c0_7 = arith.constant 0 : index
    %c0_8 = arith.constant 0 : index
    %10 = vector.load %arg5[%c0_6, %c0_7, %c0_8] : memref<1x9x32xf32, #tpu.memory_space<vmem>>, vector<1x8x32xf32>
    tpu.vector_store %arg5[%c0_6, %c0_7, %c0_8], %9 {strides = array<i32>} : memref<1x9x32xf32, #tpu.memory_space<vmem>>, vector<1x8x32xf32>,
    %c0_9 = arith.constant 0 : index
    %c7 = arith.constant 7 : index
    %c0_10 = arith.constant 0 : index
    %11 = vector.load %arg2[%c0_9, %c7, %c0_10] : memref<1x8x32xf32, #tpu.memory_space<vmem>>, vector<1x1x32xf32>
    %12 = vector.extract_strided_slice %0 {offsets = [8, 0], sizes = [1, 32], strides = [1, 1]} : vector<9x32xf32> to vector<1x32xf32>
    %13 = vector.shape_cast %12 : vector<1x32xf32> to vector<1x1x32xf32>
    %14 = arith.addf %11, %13 : vector<1x1x32xf32>
    %c0_11 = arith.constant 0 : index
    %c8 = arith.constant 8 : index
    %c0_12 = arith.constant 0 : index
    %15 = vector.load %arg5[%c0_11, %c8, %c0_12] : memref<1x9x32xf32, #tpu.memory_space<vmem>>, vector<1x1x32xf32>
    tpu.vector_store %arg5[%c0_11, %c8, %c0_12], %14 {strides = array<i32>} : memref<1x9x32xf32, #tpu.memory_space<vmem>>, vector<1x1x32xf32>,
    return
  }
  func.func @transform_0(%arg0: i32, %arg1: i32) -> (i32, i32, i32) {
    %c0_i32 = arith.constant 0 : i32
    %c0_i32_0 = arith.constant 0 : i32
    return %arg0, %c0_i32, %arg1 : i32, i32, i32
  }
  func.func @transform_1(%arg0: i32, %arg1: i32) -> (i32, i32) {
    %c0_i32 = arith.constant 0 : i32
    %c0_i32_0 = arith.constant 0 : i32
    return %c0_i32, %arg1 : i32, i32
  }
  func.func @transform_2(%arg0: i32, %arg1: i32) -> (i32, i32) {
    %c0_i32 = arith.constant 0 : i32
    %c0_i32_0 = arith.constant 0 : i32
    return %c0_i32, %arg1 : i32, i32
  }
  func.func @transform_3(%arg0: i32, %arg1: i32) -> (i32, i32, i32) {
    %c0_i32 = arith.constant 0 : i32
    %c0_i32_0 = arith.constant 0 : i32
    return %arg0, %c0_i32, %arg1 : i32, i32, i32
  }
}

</mosaic_0001>

<bundles_post_ra>
// kernel: tpu_custom_call.1
= control target key start
LH: loop header
LB: loop body
LE: loop exit
PB: predicated region body
PF: predicated region fallthrough
CT: control target
= control target key end

     0   :  { %8 = vsyncpa [#allocation3], 0  ;;  %s761_s0 = inlined_call_operand.hbm [shape: f32[2,8,32], index: 0, kind: input, shape index: {}]   ;;  %s762_s1 = inlined_call_operand.vmem [shape: f32[1,32], index: 1, kind: input, shape index: {}]   ;;  %s763_s2 = inlined_call_operand.hbm [shape: f32[9,32], index: 2, kind: input, shape index: {}]   ;;  %s764_s3 = inlined_call_operand.vmem [shape: f32[2,9,32], index: 3, kind: output, shape index: {}]  }
   0x1   :  { %10 = vsyncpa [#allocation3 + $0x1], 0 }
   0x2   :  { %11 = vsyncpa [#allocation5], 0  ;;  %s603_s12 = smov 0   ;;  %s605_s13 = smov 0  }
   0x3   :  { %s607_s14 = smov 0   ;;  %s609_s15 = smov 0  }
   0x4   :  { %s611_s16 = smov 0   ;;  %s613_s17 = smov 0  }
   0x5 LB: > { %s381_s18 = sadd.s32 4294967295, %s577_s17   ;;  %p51_p0 = scmp.ne.s32.totalorder %s561_s13, %s557_s12  ;;  %s577_s17 = sphi %s613_s17, %s17_s17   ;;  %s573_s16 = sphi %s611_s16, %s781_s16   ;;  %s569_s15 = sphi %s609_s15, %s780_s15   ;;  %s565_s14 = sphi %s607_s14, %s779_s14   ;;  %s561_s13 = sphi %s605_s13, %s778_s13   ;;  %s557_s12 = sphi %s603_s12, %s777_s12  }
   0x6   : > { %p633_p1 = scmp.eq.s32.totalorder %s381_s18, 0  ;;  %p383_p2 = scmp.ge.s32.totalorder %s577_s17, 1 }
   0x7   : > { %p142_p3 = scmp.lt.s32.totalorder %s577_s17, 3  ;;  %s579_s22 = smov [#allocation4]  }
   0x8   : > { %s769_s19 = scalar_select %p633_p1, 1, 0 }
   0x9   : > { %p641_p4 = por %p633_p1, %p51_p0  ;;  %p645_p5 = pnand %p383_p2, %p142_p3 }
   0xa   : > { %s162_s23 = sshll.u32 %s579_s22, 4  ;;  %s29_s25 = sadd.s32 1, %s573_s16  ;;  %s163_s23 = int_to_ptr.vmem [resolvable:$true] %s162_s23 }
   0xb   : > { %s770_s20 = scalar_select %p641_p4, 1, 0 }
   0xc   : > { %s771_s21 = scalar_select %p645_p5, 1, 0 }
   0xd   : > { %p403_p6 = pneg %p645_p5  ;;  %s465_s28 = scalar_lea.hbm %s763_s2, 256 }
   0xe   : > { %p466_p8 = scmp.ne.s32.totalorder %s763_s2, %s465_s28  ;;  %p472_p12 = scmp.lt.u32.totalorder %s465_s28, %s763_s2 }
   0xf   : > { %p653_p7 = pnand %p403_p6, %p633_p1 }
  0x11   : > { %p467_p9 = pneg %p653_p7 }
  0x13   : > { %p468_p10 = pnand %p467_p9, %p466_p8 }
  0x15   : > { %p469_p11 = pneg %p468_p10 }
  0x17   : > { %p474_p13 = pnand %p472_p12, %p469_p11 }
  0x19   : > { %477 = shalt.err (!%p474_p13)
}
  0x1a   : > { %s478_s6 = scalar_lea.vmem %s163_s23, 256  ;;  %p486_p6 = scmp.lt.s32.totalorder %s163_s23, %s163_s23 }
  0x1b   : > { %p479_p0 = scmp.ne.s32.totalorder %s163_s23, %s478_s6  ;;  %p487_p1 = scmp.lt.s32.totalorder %s478_s6, %s478_s6 }
  0x1d   : > { %p481_p2 = pnand %p479_p0, %p467_p9  ;;  %p488_p4 = por %p487_p1, %p486_p6 }
  0x1f   : > { %p482_p3 = pneg %p481_p2 }
  0x21   : > { %p489_p5 = pnand %p488_p4, %p482_p3 }
  0x23   : > { %492 = shalt.err (!%p489_p5)
}
  0x24   : > { %s580_s7 = smov 128   ;;  %s581_s8 = smov 8  }
  0x25   : > { %406 = dma.hbm_to_vmem [thread:$0]  (!%p653_p7), %s763_s2, 256, %s163_s23, [#allocation5], %s580_s7, %s580_s7, %s581_s8  }
  0x26   : > { %p31_p1 = scmp.ge.s32.totalorder %s29_s25, 2  ;;  %s38_s11 = sadd.s32 1, %s565_s14 }
  0x27   : > { %p45_p4 = scmp.ne.s32.totalorder %s565_s14, %s561_s13  ;;  %p46_p5 = scmp.eq.s32.totalorder %s577_s17, 0 }
  0x28   : > { %s783_s25 = smov (%p31_p1, %s29_s25), 0  ;;  %p412_p9 = scmp.lt.s32.totalorder %s577_s17, 2 }
  0x29   : > { %p47_p8 = por %p46_p5, %p45_p4  ;;  %s33_s12 = ssub.s32 %s573_s16, %s783_s25 }
  0x2a   : > { %s176_s18 = sand.u32 1, %s565_s14   ;;  %p36_p10 = scmp.eq.s32.totalorder %s33_s12, 0 }
  0x2b   : > { %s387_s22 = sshll.u32 %s176_s18, 3  ;;  %s388_s26 = sshll.u32 %s573_s16, 7 }
  0x2c   : > { %s686_s27 = scalar_select %p36_p10, %s565_s14, %s38_s11  }
  0x2d   : > { %s691_s23 = scalar_lea.hbm %s761_s0, %s388_s26  ;;  %s180_s29 = scalar_lea.vmem [#allocation2], %s387_s22 }
  0x2e   : > { %s188_s30 = sshll.u32 %s180_s29, 4  ;;  %p693_p7 = pnand %p412_p9, %p47_p8  ;;  %s697_s30 = int_to_ptr.vmem [resolvable:$true] %s188_s30 }
  0x2f   : > { %s177_s5 = scalar_lea.sflag [#allocation3], %s176_s18  ;;  %s493_s6 = scalar_lea.hbm %s691_s23, 128 }
  0x30   : > { %p494_p11 = scmp.ne.s32.totalorder %s691_s23, %s493_s6  ;;  %p495_p12 = pneg %p693_p7 }
  0x31   : > { %s498_s9 = scalar_lea.hbm %s761_s0, 256  ;;  %p499_p2 = scmp.lt.u32.totalorder %s691_s23, %s761_s0 }
  0x32   : > { %p496_p13 = pnand %p495_p12, %p494_p11  ;;  %p500_p3 = scmp.lt.u32.totalorder %s498_s9, %s493_s6 }
  0x33   : > { %p502_p1 = scmp.lt.u32.totalorder %s493_s6, %s691_s23 }
  0x34   : > { %p497_p0 = pneg %p496_p13  ;;  %p501_p6 = por %p500_p3, %p499_p2 }
  0x36   : > { %p503_p4 = por %p502_p1, %p501_p6 }
  0x38   : > { %p504_p5 = pnand %p503_p4, %p497_p0 }
  0x3a   : > { %507 = shalt.err (!%p504_p5)
}
  0x3b   : > { %s508_s12 = scalar_lea.vmem %s697_s30, 128  ;;  %s582_s18 = smov [#allocation2]  }
  0x3c   : > { %p509_p8 = scmp.ne.s32.totalorder %s697_s30, %s508_s12  ;;  %s513_s22 = sshll.u32 %s582_s18, 4  ;;  %s514_s22 = int_to_ptr.vmem [resolvable:$false] %s513_s22 }
  0x3d   : > { %s515_s26 = scalar_lea.vmem %s514_s22, 256  ;;  %p516_p11 = scmp.lt.s32.totalorder %s697_s30, %s514_s22 }
  0x3e   : > { %p511_p9 = pnand %p509_p8, %p495_p12  ;;  %p517_p13 = scmp.lt.s32.totalorder %s515_s26, %s508_s12 }
  0x40   : > { %p512_p10 = pneg %p511_p9  ;;  %p518_p2 = por %p517_p13, %p516_p11 }
  0x42   : > { %p519_p3 = pnand %p518_p2, %p512_p10 }
  0x44   : > { %522 = shalt.err (!%p519_p3)
}
  0x45   : > { %410 = dma.hbm_to_vmem [thread:$0]  (!%p693_p7), %s691_s23, 128, %s697_s30, %s177_s5  }
  0x46   : > { %p774_p0 = scmp.ne.s32.totalorder %s771_s21, 0 }
  0x47   : > { %s199_s24 = sand.u32 (!%p774_p0), 1, %s561_s13   ;;  %p775_p12 = scmp.ne.s32.totalorder (!%p774_p0), %s770_s20, 0 }
  0x48   : > { %197 = sbr.rel (%p774_p0) target bundleno = 92 (0x5c), region = 32  ;;  %s390_s28 = sshll.u32 (!%p774_p0), %s199_s24, 3 }
  0x49   : > { %s200_s29 = scalar_lea.sflag (!%p774_p0), [#allocation3], %s199_s24  ;;  %s203_s6 = scalar_lea.vmem (!%p774_p0), [#allocation2], %s390_s28 }
  0x4f   : > { %548 = dma.done.wait (%p775_p12), %s200_s29, 128  }
  0x50   : > { %550 = vsyncadd (%p775_p12), %s200_s29, 4294967168  ;;  %p776_p6 = scmp.ne.s32.totalorder %s769_s19, 0 }
  0x52   : > { %552 = dma.done.wait (%p776_p6), [#allocation5], 256  }
  0x53   : > { %554 = vsyncadd (%p776_p6), [#allocation5], 4294967040  ;;  %p239_p7 = scmp.lt.s32.totalorder %s569_s15, 1  ;;  %v247_v0 = vld [vmem:[#allocation4] sm:$0xff]  ;;  %v249_v1 = vld [vmem:[%s762_s1] sm:$0x1] }
  0x54   : > { %v251_v2 = vld [vmem:[%s203_s6] sm:$0x7f]  ;;  %v253_v3 = vrot.slane %v247_v0, 1  ;;  %v248_v4 = vld [vmem:[#allocation4 + $0x8] sm:$0x1]  ;;  %vm265_vm0 = vcmask 253952   ;;  %v250_v7 = vadd.f32 %v249_v1, %v247_v0 }
  0x55   : > { %s785_s15 = smov (!%p239_p7, %s569_s15), 1  ;;  %v263_v5 = vld [vmem:[%s203_s6 + $0x7] sm:$0x1]  ;;  %vm259_vm1 = vcmask 1040384   ;;  %vm261_vm2 = vcmask 261120  }
  0x56   : > { %s396_s21 = sshll.u32 %s785_s15, 4  ;;  %v264_v6 = vadd.f32 %v263_v5, %v248_v4  ;;  %v255_v8 = vadd.f32 %v253_v3, %v251_v2 }
  0x57   : > { %s246_s5 = scalar_lea.vmem %s764_s3, %s396_s21 }
  0x58   : > { %266 = vst.msk [vmem:[%s246_s5 + $0x8] sm:$0x1] %vm265_vm0, %v264_v6  ;;  %v257_v9 = vrot.slane %v255_v8, 7 }
  0x5a   : > { %v260_v10 = vsel %vm259_vm1, %v250_v7, %v257_v9 }
  0x5b   : > { %262 = vst.msk [vmem:[%s246_s5] sm:$0xff] %vm261_vm2, %v260_v10 }
  0x5c PF: > { %s17_s17 = sadd.s32 1, %s577_s17   ;;  %s777_s12 = smov %s561_s13 }
  0x5d   : > { %p14_p1 = scmp.ge.s32.totalorder %s17_s17, 4   ;;  %s778_s13 = smov %s565_s14 }
  0x5e   : > { %s779_s14 = smov %s686_s27  ;;  %s780_s15 = smov %s573_s16 }
  0x5f   : > { %s781_s16 = smov %s783_s25  ;;  %16 = sbr.rel (!%p14_p1) target bundleno = 5 (0x5), region = 80 }
  0x66   :  { %294 = vsyncpa [#allocation3], 1 }
  0x67   :  { %296 = vsyncpa [#allocation3 + $0x1], 1 }
  0x68   :  { %297 = vsyncpa [#allocation5], 1 }

</bundles_post_ra>
